<compile_context>
chip_gen: v7x
topology: tpu7x:2x2x1
jax: 0.10.0
libtpu: 0.0.40
codegen_flags: <defaults>
</compile_context>

<pallas_src>
from functools import partial

import numpy as np

import jax
import jax.numpy as jnp
from jax.experimental import pallas as pl
from jax.experimental.pallas import tpu as pltpu


_LANE = 128
_DEFAULT_BLOCK_ROWS = 1024
# Budget for the (double-buffered) streamed input tile: 2 * TM * L * itemsize
# should stay <= 4 MiB, comfortably inside v5e's 16 MiB scoped-VMEM default.
_INPUT_VMEM_BUDGET = 4 * 1024 * 1024


def _round_up(x: int, m: int) -> int:
    return (x + m - 1) // m * m


def _pick_block_rows(num_seq: int, num_labels: int, itemsize: int,
                     requested: int) -> int:
    bytes_per_row = max(1, num_labels * itemsize)
    cap = _INPUT_VMEM_BUDGET // (2 * bytes_per_row)
    cap = max(_LANE, (cap // _LANE) * _LANE)
    tm = max(_LANE, min(int(requested), cap))
    # Don't over-pad tiny inputs: never tile wider than the (128-rounded) T.
    tm = min(tm, _round_up(max(num_seq, 1), _LANE))
    return tm


def _argmax_kernel(em_ref, idx_ref):
    """Per-row argmax over the label (lane) axis, stored lane-dense.

    em_ref:  (TM, L) logits for TM consecutive timesteps.
    idx_ref: (1, 1, TM) int32 argmax indices (first-occurrence tie-break,
             matching torch.argmax / jnp.argmax).
    """
    x = em_ref[...]                                                    # (TM, L)
    tm, nl = x.shape

    row_max = jnp.max(x, axis=-1, keepdims=True)                       # (TM, 1)
    lane = jax.lax.broadcasted_iota(jnp.int32, (tm, nl), 1)            # (TM, L)
    # First lane attaining the row max (ties -> smallest index).
    cand = jnp.where(x == row_max, lane, jnp.int32(nl))                # (TM, L)
    first = jnp.min(cand, axis=-1, keepdims=True)                      # (TM, 1)
    # Exactly one 1.0 per row (finite-logits assumption, see module docstring).
    onehot = (cand == first).astype(jnp.float32)                       # (TM, L)

    # Lane-dense "transpose": (1, L) @ (TM, L)^T -> (1, TM) on the MXU.
    # Values are exact small integers, so the f32 accumulate is exact.
    iota_f = jax.lax.broadcasted_iota(jnp.int32, (1, nl), 1).astype(jnp.float32)
    idx_f = jax.lax.dot_general(
        iota_f, onehot,
        dimension_numbers=(((1,), (1,)), ((), ())),
        preferred_element_type=jnp.float32)                            # (1, TM)
    idx_ref[...] = idx_f.astype(jnp.int32).reshape(idx_ref.shape)


@partial(jax.jit, static_argnames=("block_rows",))
def pallas_argmax_last_dim(emission: jax.Array,
                           *, block_rows: int = _DEFAULT_BLOCK_ROWS) -> jax.Array:
    """emission: [T, L] -> [T] int32 argmax along axis -1 (Pallas TPU kernel)."""
    if emission.ndim != 2:
        raise ValueError(f"expected [num_seq, num_label], got {emission.shape}")
    t, l = emission.shape
    tm = _pick_block_rows(t, l, emission.dtype.itemsize, block_rows)
    t_pad = _round_up(max(t, 1), tm)
    if t_pad != t:
        # Zero-padded tail rows are discarded after the kernel.
        emission = jnp.pad(emission, ((0, t_pad - t), (0, 0)))
    g = t_pad // tm

    out = pl.pallas_call(
        _argmax_kernel,
        out_shape=jax.ShapeDtypeStruct((g, 1, tm), jnp.int32),
        grid_spec=pltpu.PrefetchScalarGridSpec(
            num_scalar_prefetch=0,
            grid=(g,),
            in_specs=[pl.BlockSpec((tm, l), lambda i: (i, 0))],
            out_specs=pl.BlockSpec((1, 1, tm), lambda i: (i, 0, 0)),
        ),
        compiler_params=pltpu.CompilerParams(
            dimension_semantics=("parallel",),
        ),
    )(emission)
    return out.reshape(t_pad)[:t]


class GreedyCTCDecoder:
    """JAX / Pallas port of the PyTorch GreedyCTCDecoder module."""

    def __init__(self, labels, blank: int = 0):
        self.labels = labels
        self.blank = blank

    def __call__(self, emission: jax.Array) -> str:
        # Hot path: tiled, lane-dense argmax over the label dim (Pallas kernel).
        indices = pallas_argmax_last_dim(jnp.asarray(emission))        # [T] int32
        # Single bulk device->host transfer (no per-element device syncs).
        idx = np.asarray(indices)
        if idx.size == 0:
            return ""
        # TODO(synk): unique_consecutive + blank removal + Python string join
        # are dynamic-length / host-side ops with no clean Pallas equivalent;
        # done in numpy over the small int32 index vector.
        keep = np.concatenate(([True], idx[1:] != idx[:-1]))
        idx = idx[keep]
        idx = idx[idx != self.blank]
        return "".join(self.labels[int(i)] for i in idx)


def _reference_transcript(emission, labels, blank) -> str:
    idx = np.asarray(jnp.argmax(emission, axis=-1))
    if idx.size == 0:
        return ""
    keep = np.concatenate(([True], idx[1:] != idx[:-1]))
    idx = idx[keep]
    idx = idx[idx != blank]
    return "".join(labels[int(i)] for i in idx)


if __name__ == "__main__":
    # Small, deterministic example: num_seq=16 timesteps, num_label=32 labels.
    num_seq, num_label = 16, 32
    labels = ["-"] + [chr(ord("a") + i) for i in range(num_label - 1)]  # idx 0 = blank

    key = jax.random.PRNGKey(0)
    k_main, k_a, k_b, k_c = jax.random.split(key, 4)
    emission = jax.random.normal(k_main, (num_seq, num_label), dtype=jnp.float32)

    decoder = GreedyCTCDecoder(labels, blank=0)

    # Run the kernel once and block on its result.
    idx = pallas_argmax_last_dim(emission)
    jax.block_until_ready(idx)

    # Correctness: argmax itself (first-occurrence tie-break).
    ref_idx = jnp.argmax(emission, axis=-1).astype(jnp.int32)
    assert jnp.array_equal(idx, ref_idx), (idx, ref_idx)

    # Correctness: full decode semantics (argmax -> unique_consecutive -> blank removal).
    transcript = decoder(emission)
    assert transcript == _reference_transcript(emission, labels, 0), transcript

    # Extra checks: multi-tile grids, T-padding, odd label count, default tiling.
    for (t, l, br), k in (((512, 32, 128), k_a),
                          ((300, 29, 128), k_b),
                          ((1500, 40, _DEFAULT_BLOCK_ROWS), k_c)):
        em = jax.random.normal(k, (t, l), dtype=jnp.float32)
        got = pallas_argmax_last_dim(em, block_rows=br)
        jax.block_until_ready(got)
        want = jnp.argmax(em, axis=-1).astype(jnp.int32)
        assert jnp.array_equal(got, want), (t, l)

    print("KERNEL_OK")
</pallas_src>

<mosaic_0001>
module attributes {stable_mosaic.version = 11 : i64} {
  func.func @_argmax_kernel(%arg0: i32, %arg1: memref<128x32xf32, #tpu.memory_space<vmem>>, %arg2: memref<1x1x128xi32, #tpu.memory_space<vmem>>) attributes {dimension_semantics = [#tpu.dimension_semantics<parallel>], iteration_bounds = array<i64: 1>, scalar_prefetch = 0 : i64, scratch_operands = 0 : i64, tpu.core_type = #tpu.core_type<tc>, window_params = [{transform_indices = @transform_0, window_bounds = array<i64: 128, 32>}, {transform_indices = @transform_1, window_bounds = array<i64: 1, 1, 128>}]} {
    %c0 = arith.constant 0 : index
    %c0_0 = arith.constant 0 : index
    %0 = vector.load %arg1[%c0, %c0_0] : memref<128x32xf32, #tpu.memory_space<vmem>>, vector<128x32xf32>
    %cst = arith.constant dense<0xFF800000> : vector<128xf32>
    %1 = vector.multi_reduction <maximumf>, %0, %cst [1] : vector<128x32xf32> to vector<128xf32>
    %2 = vector.shape_cast %1 : vector<128xf32> to vector<128x1xf32>
    %3 = tpu.iota {dimensions = array<i32: 1>} : vector<128x32xi32>
    %4 = vector.broadcast %2 : vector<128x1xf32> to vector<128x32xf32>
    %5 = arith.cmpf oeq, %0, %4 : vector<128x32xf32>
    %c32_i32 = arith.constant 32 : i32
    %6 = vector.broadcast %c32_i32 : i32 to vector<128x32xi32>
    %7 = arith.select %5, %3, %6 : vector<128x32xi1>, vector<128x32xi32>
    %cst_1 = arith.constant dense<2147483647> : vector<128xi32>
    %8 = vector.multi_reduction <minsi>, %7, %cst_1 [1] : vector<128x32xi32> to vector<128xi32>
    %9 = vector.shape_cast %8 : vector<128xi32> to vector<128x1xi32>
    %10 = vector.broadcast %9 : vector<128x1xi32> to vector<128x32xi32>
    %11 = arith.cmpi eq, %7, %10 : vector<128x32xi32>
    %12 = arith.extui %11 : vector<128x32xi1> to vector<128x32xi32>
    %13 = arith.sitofp %12 : vector<128x32xi32> to vector<128x32xf32>
    %14 = tpu.iota {dimensions = array<i32: 1>} : vector<1x32xi32>
    %15 = arith.sitofp %14 : vector<1x32xi32> to vector<1x32xf32>
    %cst_2 = arith.constant dense<0.000000e+00> : vector<1x128xf32>
    %16 = tpu.matmul %15, %13, %cst_2 {dimension_numbers = #tpu.dot_dimension_numbers<[1], [1], [0], [0], [0, 0, 1, 0], [], []>} : vector<1x32xf32>, vector<128x32xf32>, vector<1x128xf32> -> vector<1x128xf32>
    %17 = arith.fptosi %16 : vector<1x128xf32> to vector<1x128xi32>
    %18 = vector.shape_cast %17 : vector<1x128xi32> to vector<1x1x128xi32>
    %c0_3 = arith.constant 0 : index
    %c0_4 = arith.constant 0 : index
    %c0_5 = arith.constant 0 : index
    %19 = vector.load %arg2[%c0_3, %c0_4, %c0_5] : memref<1x1x128xi32, #tpu.memory_space<vmem>>, vector<1x1x128xi32>
    tpu.vector_store %arg2[%c0_3, %c0_4, %c0_5], %18 {strides = array<i32>} : memref<1x1x128xi32, #tpu.memory_space<vmem>>, vector<1x1x128xi32>,
    return
  }
  func.func @transform_0(%arg0: i32) -> (i32, i32) {
    %c0_i32 = arith.constant 0 : i32
    %c0_i32_0 = arith.constant 0 : i32
    return %arg0, %c0_i32 : i32, i32
  }
  func.func @transform_1(%arg0: i32) -> (i32, i32, i32) {
    %c0_i32 = arith.constant 0 : i32
    %c0_i32_0 = arith.constant 0 : i32
    %c0_i32_1 = arith.constant 0 : i32
    return %arg0, %c0_i32, %c0_i32_0 : i32, i32, i32
  }
}

</mosaic_0001>

<bundles_post_ra>
// kernel: pallas_argmax_last_dim.1
= control target key start
LH: loop header
LB: loop body
LE: loop exit
PB: predicated region body
PF: predicated region fallthrough
CT: control target
= control target key end

     0   :  { %vm24_vm0 = vcmask 261120   ;;  %v73_v32 = vlaneseq  ;;  %s1116_s0 = inlined_call_operand.vmem [shape: f32[128,32], index: 0, kind: input, shape index: {}]   ;;  %s1117_s1 = inlined_call_operand.vmem [shape: s32[1,1,128], index: 1, kind: output, shape index: {}]  }
   0x1   :  { %v8_v0 = vld [vmem:[%s1116_s0] sm:$0xff]  ;;  %v10_v1 = vld [vmem:[%s1116_s0 + $0x10] sm:$0xff]  ;;  %v667_v2 = vld [vmem:[%s1116_s0 + $0x8] sm:$0xff] }
   0x2   :  { %v25_v3 = vsel %vm24_vm0, %v8_v0, -inf  ;;  %v31_v4 = vsel %vm24_vm0, %v10_v1, -inf  ;;  %v11_v5 = vld [vmem:[%s1116_s0 + $0x18] sm:$0xff]  ;;  %v28_v6 = vsel %vm24_vm0, %v667_v2, -inf  ;;  %v680_v8 = vld [vmem:[%s1116_s0 + $0x20] sm:$0xff]  ;;  %v685_v9 = vld [vmem:[%s1116_s0 + $0x28] sm:$0xff] }
   0x3   :  { %26 = vmax.xlane.f32.xlu0 %v25_v3  ;;  %32 = vmax.xlane.f32.xlu1 %v31_v4  ;;  %v34_v7 = vsel %vm24_vm0, %v11_v5, -inf  ;;  %v37_v10 = vsel %vm24_vm0, %v680_v8, -inf  ;;  %v40_v11 = vsel %vm24_vm0, %v685_v9, -inf  ;;  %v694_v12 = vld [vmem:[%s1116_s0 + $0x30] sm:$0xff]  ;;  %v699_v13 = vld [vmem:[%s1116_s0 + $0x38] sm:$0xff]  ;;  %v708_v16 = vld [vmem:[%s1116_s0 + $0x40] sm:$0xff] }
   0x4   :  { %v43_v14 = vsel %vm24_vm0, %v694_v12, -inf  ;;  %v46_v15 = vsel %vm24_vm0, %v699_v13, -inf  ;;  %v713_v17 = vld [vmem:[%s1116_s0 + $0x48] sm:$0xff]  ;;  %v49_v18 = vsel %vm24_vm0, %v708_v16, -inf  ;;  %v722_v20 = vld [vmem:[%s1116_s0 + $0x50] sm:$0xff]  ;;  %v727_v21 = vld [vmem:[%s1116_s0 + $0x58] sm:$0xff] }
   0x5   :  { %v52_v19 = vsel %vm24_vm0, %v713_v17, -inf  ;;  %v55_v22 = vsel %vm24_vm0, %v722_v20, -inf  ;;  %v58_v23 = vsel %vm24_vm0, %v727_v21, -inf  ;;  %v736_v24 = vld [vmem:[%s1116_s0 + $0x60] sm:$0xff]  ;;  %v741_v25 = vld [vmem:[%s1116_s0 + $0x68] sm:$0xff]  ;;  %v750_v28 = vld [vmem:[%s1116_s0 + $0x70] sm:$0xff] }
   0x6   :  { %v61_v26 = vsel %vm24_vm0, %v736_v24, -inf  ;;  %v64_v27 = vsel %vm24_vm0, %v741_v25, -inf  ;;  %v755_v29 = vld [vmem:[%s1116_s0 + $0x78] sm:$0xff]  ;;  %v67_v30 = vsel %vm24_vm0, %v750_v28, -inf  ;;  %v761_v33 = vand.u32 127, %v73_v32 }
   0x7   :  { %29 = vmax.xlane.f32.xlu0 %v28_v6  ;;  %35 = vmax.xlane.f32.xlu1 %v34_v7  ;;  %v70_v31 = vsel %vm24_vm0, %v755_v29, -inf }
   0xb   :  { %38 = vmax.xlane.f32.xlu0 %v37_v10  ;;  %41 = vmax.xlane.f32.xlu1 %v40_v11 }
   0xf   :  { %44 = vmax.xlane.f32.xlu0 %v43_v14  ;;  %47 = vmax.xlane.f32.xlu1 %v46_v15 }
  0x13   :  { %50 = vmax.xlane.f32.xlu0 %v49_v18  ;;  %53 = vmax.xlane.f32.xlu1 %v52_v19 }
  0x17   :  { %56 = vmax.xlane.f32.xlu0 %v55_v22  ;;  %59 = vmax.xlane.f32.xlu1 %v58_v23 }
  0x1b   :  { %62 = vmax.xlane.f32.xlu0 %v61_v26  ;;  %65 = vmax.xlane.f32.xlu1 %v64_v27 }
  0x1f   :  { %68 = vmax.xlane.f32.xlu0 %v67_v30  ;;  %71 = vmax.xlane.f32.xlu1 %v70_v31 }
  0x90   :  { %v27_v34 = vpop.xlane.xlu0 %26  ;;  %v33_v35 = vpop.xlane.xlu1 %32 }
  0x91   :  { %vm75_vm1 = vcmp.eq.f32.partialorder %v8_v0, %v27_v34  ;;  %vm77_vm2 = vcmp.eq.f32.partialorder %v10_v1, %v33_v35 }
  0x92   :  { %v764_v36 = vsel %vm75_vm1, %v761_v33, 32  ;;  %v767_v37 = vsel %vm77_vm2, %v761_v33, 32 }
  0x93   :  { %v771_v38 = vsel %vm24_vm0, %v764_v36, 2147483647  ;;  %v775_v39 = vsel %vm24_vm0, %v767_v37, 2147483647 }
  0x94   :  { %v30_v40 = vpop.xlane.xlu0 %29  ;;  %v36_v41 = vpop.xlane.xlu1 %35  ;;  %v109_v42 = vshra.s32 %v771_v38, 16  ;;  %v139_v43 = vshra.s32 %v775_v39, 16 }
  0x95   :  { %vm76_vm3 = vcmp.eq.f32.partialorder %v667_v2, %v30_v40  ;;  %vm78_vm4 = vcmp.eq.f32.partialorder %v11_v5, %v36_v41 }
  0x96   :  { %v781_v44 = vsel %vm76_vm3, %v761_v33, 32  ;;  %v784_v45 = vsel %vm78_vm4, %v761_v33, 32  ;;  %v786_v46 = vcvt.s32.f32 %v109_v42  ;;  %v797_v51 = vcvt.s32.f32 %v139_v43 }
  0x97   :  { %v790_v47 = vsel %vm24_vm0, %v781_v44, 2147483647  ;;  %v794_v48 = vsel %vm24_vm0, %v784_v45, 2147483647 }
  0x98   :  { %112 = vmin.xlane.f32.xlu0 %v786_v46  ;;  %v39_v49 = vpop.xlane.xlu0 %38  ;;  %v42_v50 = vpop.xlane.xlu1 %41  ;;  %v124_v52 = vshra.s32 %v790_v47, 16  ;;  %v154_v53 = vshra.s32 %v794_v48, 16 }
  0x99   :  { %vm79_vm5 = vcmp.eq.f32.partialorder %v680_v8, %v39_v49  ;;  %vm80_vm6 = vcmp.eq.f32.partialorder %v685_v9, %v42_v50 }
  0x9a   :  { %v804_v54 = vsel %vm79_vm5, %v761_v33, 32  ;;  %v807_v55 = vsel %vm80_vm6, %v761_v33, 32  ;;  %v809_v56 = vcvt.s32.f32 %v124_v52  ;;  %v821_v61 = vcvt.s32.f32 %v154_v53 }
  0x9b   :  { %v813_v57 = vsel %vm24_vm0, %v804_v54, 2147483647  ;;  %v817_v58 = vsel %vm24_vm0, %v807_v55, 2147483647 }
  0x9c   :  { %142 = vmin.xlane.f32.xlu0 %v797_v51  ;;  %127 = vmin.xlane.f32.xlu1 %v809_v56  ;;  %v45_v59 = vpop.xlane.xlu0 %44  ;;  %v48_v60 = vpop.xlane.xlu1 %47  ;;  %v169_v62 = vshra.s32 %v813_v57, 16  ;;  %v184_v63 = vshra.s32 %v817_v58, 16 }
  0x9d   :  { %vm81_vm7 = vcmp.eq.f32.partialorder %v694_v12, %v45_v59  ;;  %vm82_vm8 = vcmp.eq.f32.partialorder %v699_v13, %v48_v60 }
  0x9e   :  { %v828_v0 = vsel %vm81_vm7, %v761_v33, 32  ;;  %v831_v1 = vsel %vm82_vm8, %v761_v33, 32  ;;  %v833_v2 = vcvt.s32.f32 %v169_v62  ;;  %v845_v7 = vcvt.s32.f32 %v184_v63 }
  0x9f   :  { %v837_v3 = vsel %vm24_vm0, %v828_v0, 2147483647  ;;  %v841_v4 = vsel %vm24_vm0, %v831_v1, 2147483647 }
  0xa0   :  { %157 = vmin.xlane.f32.xlu1 %v821_v61  ;;  %172 = vmin.xlane.f32.xlu0 %v833_v2  ;;  %v51_v5 = vpop.xlane.xlu0 %50  ;;  %v54_v6 = vpop.xlane.xlu1 %53  ;;  %v199_v8 = vshra.s32 %v837_v3, 16  ;;  %v214_v9 = vshra.s32 %v841_v4, 16 }
  0xa1   :  { %vm83_vm9 = vcmp.eq.f32.partialorder %v708_v16, %v51_v5  ;;  %vm84_vm10 = vcmp.eq.f32.partialorder %v713_v17, %v54_v6 }
  0xa2   :  { %v852_v10 = vsel %vm83_vm9, %v761_v33, 32  ;;  %v855_v11 = vsel %vm84_vm10, %v761_v33, 32  ;;  %v857_v12 = vcvt.s32.f32 %v199_v8  ;;  %v869_v17 = vcvt.s32.f32 %v214_v9 }
  0xa3   :  { %v861_v13 = vsel %vm24_vm0, %v852_v10, 2147483647  ;;  %v865_v14 = vsel %vm24_vm0, %v855_v11, 2147483647  ;;  %v108_v9 = vand.u32 65535, %v771_v38  ;;  %v153_v38 = vand.u32 65535, %v794_v48 }
  0xa4   :  { %187 = vmin.xlane.f32.xlu1 %v845_v7  ;;  %202 = vmin.xlane.f32.xlu0 %v857_v12  ;;  %v57_v15 = vpop.xlane.xlu0 %56  ;;  %v60_v16 = vpop.xlane.xlu1 %59  ;;  %v229_v18 = vshra.s32 %v861_v13, 16  ;;  %v244_v19 = vshra.s32 %v865_v14, 16  ;;  %v183_v48 = vand.u32 65535, %v817_v58  ;;  %v213_v58 = vand.u32 65535, %v841_v4 }
  0xa5   :  { %vm85_vm11 = vcmp.eq.f32.partialorder %v722_v20, %v57_v15  ;;  %vm86_vm12 = vcmp.eq.f32.partialorder %v727_v21, %v60_v16  ;;  %v110_v16 = vcvt.s32.f32 %v108_v9  ;;  %v243_v4 = vand.u32 65535, %v865_v14 }
  0xa6   :  { %v876_v22 = vsel %vm85_vm11, %v761_v33, 32  ;;  %v879_v23 = vsel %vm86_vm12, %v761_v33, 32  ;;  %v881_v26 = vcvt.s32.f32 %v229_v18  ;;  %v893_v31 = vcvt.s32.f32 %v244_v19 }
  0xa7   :  { %v885_v27 = vsel %vm24_vm0, %v876_v22, 2147483647  ;;  %v889_v30 = vsel %vm24_vm0, %v879_v23, 2147483647  ;;  %v123_v18 = vand.u32 65535, %v790_v47  ;;  %v138_v19 = vand.u32 65535, %v775_v39 }
  0xa8   :  { %217 = vmin.xlane.f32.xlu1 %v869_v17  ;;  %232 = vmin.xlane.f32.xlu0 %v881_v26  ;;  %v63_v20 = vpop.xlane.xlu0 %62  ;;  %v66_v21 = vpop.xlane.xlu1 %65  ;;  %v259_v32 = vshra.s32 %v885_v27, 16  ;;  %v274_v34 = vshra.s32 %v889_v30, 16  ;;  %v273_v14 = vand.u32 65535, %v889_v30 }
  0xa9   :  { %vm87_vm13 = vcmp.eq.f32.partialorder %v736_v24, %v63_v20  ;;  %vm88_vm14 = vcmp.eq.f32.partialorder %v741_v25, %v66_v21 }
  0xaa   :  { %v900_v35 = vsel %vm87_vm13, %v761_v33, 32  ;;  %v903_v40 = vsel %vm88_vm14, %v761_v33, 32  ;;  %v905_v41 = vcvt.s32.f32 %v259_v32  ;;  %v917_v49 = vcvt.s32.f32 %v274_v34 }
  0xab   :  { %v909_v42 = vsel %vm24_vm0, %v900_v35, 2147483647  ;;  %v913_v43 = vsel %vm24_vm0, %v903_v40, 2147483647  ;;  %v125_v34 = vcvt.s32.f32 %v123_v18 }
  0xac   :  { %247 = vmin.xlane.f32.xlu1 %v893_v31  ;;  %262 = vmin.xlane.f32.xlu0 %v905_v41  ;;  %v69_v24 = vpop.xlane.xlu0 %68  ;;  %v72_v25 = vpop.xlane.xlu1 %71  ;;  %v289_v50 = vshra.s32 %v909_v42, 16  ;;  %v304_v52 = vshra.s32 %v913_v43, 16  ;;  %v303_v30 = vand.u32 65535, %v913_v43 }
  0xad   :  { %vm89_vm15 = vcmp.eq.f32.partialorder %v750_v28, %v69_v24  ;;  %vm90_vm1 = vcmp.eq.f32.partialorder %v755_v29, %v72_v25  ;;  %v140_v24 = vcvt.s32.f32 %v138_v19  ;;  %v168_v25 = vand.u32 65535, %v813_v57 }
  0xae   :  { %v924_v53 = vsel %vm89_vm15, %v761_v33, 32  ;;  %v927_v59 = vsel %vm90_vm1, %v761_v33, 32  ;;  %v929_v60 = vcvt.s32.f32 %v289_v50  ;;  %v941_v28 = vcvt.s32.f32 %v304_v52 }
  0xaf   :  { %v933_v62 = vsel %vm24_vm0, %v924_v53, 2147483647  ;;  %v937_v63 = vsel %vm24_vm0, %v927_v59, 2147483647  ;;  %v155_v52 = vcvt.s32.f32 %v153_v38  ;;  %v198_v57 = vand.u32 65535, %v837_v3 }
  0xb0   :  { %277 = vmin.xlane.f32.xlu1 %v917_v49  ;;  %292 = vmin.xlane.f32.xlu0 %v929_v60  ;;  %v319_v29 = vshra.s32 %v933_v62, 16  ;;  %v334_v5 = vshra.s32 %v937_v63, 16  ;;  %v228_v3 = vand.u32 65535, %v861_v13  ;;  %v258_v13 = vand.u32 65535, %v885_v27 }
  0xb1   :  { %v200_v18 = vcvt.s32.f32 %v198_v57  ;;  %v288_v27 = vand.u32 65535, %v909_v42  ;;  %v318_v42 = vand.u32 65535, %v933_v62  ;;  %v333_v43 = vand.u32 65535, %v937_v63 }
  0xb2   :  { %v945_v6 = vcvt.s32.f32 %v319_v29  ;;  %v949_v8 = vcvt.s32.f32 %v334_v5  ;;  %v170_v29 = vcvt.s32.f32 %v168_v25 }
  0xb3   :  { %v290_v57 = vcvt.s32.f32 %v288_v27 }
  0xb4   :  { %307 = vmin.xlane.f32.xlu1 %v941_v28  ;;  %322 = vmin.xlane.f32.xlu0 %v945_v6 }
  0xb8   :  { %337 = vmin.xlane.f32.xlu1 %v949_v8 }
 0x125   :  { %v953_v15 = vpop.xlane.xlu0 %112 }
 0x126   :  { %vm114_vm2 = vcmp.eq.f32.partialorder %v786_v46, %v953_v15 }
 0x127   :  { %v115_v20 = vsel %vm114_vm2, %v110_v16, inf  ;;  %v185_v16 = vcvt.s32.f32 %v183_v48  ;;  %v275_v48 = vcvt.s32.f32 %v273_v14 }
 0x128   :  { %116 = vmin.xlane.f32.xlu0 %v115_v20 }
 0x129   :  { %v959_v21 = vpop.xlane.xlu1 %127  ;;  %v961_v32 = vpop.xlane.xlu0 %142 }
 0x12a   :  { %vm129_vm3 = vcmp.eq.f32.partialorder %v809_v56, %v959_v21  ;;  %vm144_vm4 = vcmp.eq.f32.partialorder %v797_v51, %v961_v32 }
 0x12b   :  { %v130_v39 = vsel %vm129_vm3, %v125_v34, inf  ;;  %v145_v46 = vsel %vm144_vm4, %v140_v24, inf  ;;  %v215_v34 = vcvt.s32.f32 %v213_v58  ;;  %v230_v24 = vcvt.s32.f32 %v228_v3 }
 0x12c   :  { %131 = vmin.xlane.f32.xlu1 %v130_v39  ;;  %146 = vmin.xlane.f32.xlu0 %v145_v46  ;;  %v245_v39 = vcvt.s32.f32 %v243_v4  ;;  %v260_v46 = vcvt.s32.f32 %v258_v13  ;;  %v335_v3 = vcvt.s32.f32 %v333_v43  ;;  %vm646_vm3 = vmmov 0  }
 0x12d   :  { %v969_v47 = vpop.xlane.xlu1 %157  ;;  %v971_v50 = vpop.xlane.xlu0 %172 }
 0x12e   :  { %vm159_vm5 = vcmp.eq.f32.partialorder %v821_v61, %v969_v47  ;;  %vm174_vm6 = vcmp.eq.f32.partialorder %v833_v2, %v971_v50 }
 0x12f   :  { %v160_v51 = vsel %vm159_vm5, %v155_v52, inf  ;;  %v175_v56 = vsel %vm174_vm6, %v170_v29, inf  ;;  %vm1047_vm6 = vmpackc.low %vm24_vm0, %vm24_vm0 }
 0x130   :  { %161 = vmin.xlane.f32.xlu1 %v160_v51  ;;  %176 = vmin.xlane.f32.xlu0 %v175_v56 }
 0x131   :  { %v979_v5 = vpop.xlane.xlu1 %187  ;;  %v981_v9 = vpop.xlane.xlu0 %202 }
 0x132   :  { %vm189_vm7 = vcmp.eq.f32.partialorder %v845_v7, %v979_v5  ;;  %vm204_vm8 = vcmp.eq.f32.partialorder %v857_v12, %v981_v9 }
 0x133   :  { %v190_v61 = vsel %vm189_vm7, %v185_v16, inf  ;;  %v205_v2 = vsel %vm204_vm8, %v200_v18, inf  ;;  %v305_v16 = vcvt.s32.f32 %v303_v30  ;;  %v320_v18 = vcvt.s32.f32 %v318_v42 }
 0x134   :  { %191 = vmin.xlane.f32.xlu1 %v190_v61  ;;  %206 = vmin.xlane.f32.xlu0 %v205_v2 }
 0x135   :  { %v989_v19 = vpop.xlane.xlu1 %217  ;;  %v991_v20 = vpop.xlane.xlu0 %232 }
 0x136   :  { %vm219_vm9 = vcmp.eq.f32.partialorder %v869_v17, %v989_v19  ;;  %vm234_vm10 = vcmp.eq.f32.partialorder %v881_v26, %v991_v20  ;;  %v239_v43 = vcvt.f32.s32 %v991_v20 }
 0x137   :  { %v220_v7 = vsel %vm219_vm9, %v215_v34, inf  ;;  %v235_v12 = vsel %vm234_vm10, %v230_v24, inf  ;;  %v134_v34 = vcvt.f32.s32 %v959_v21  ;;  %v149_v24 = vcvt.f32.s32 %v961_v32 }
 0x138   :  { %221 = vmin.xlane.f32.xlu1 %v220_v7  ;;  %236 = vmin.xlane.f32.xlu0 %v235_v12  ;;  %v164_v7 = vcvt.f32.s32 %v969_v47  ;;  %v194_v32 = vcvt.f32.s32 %v979_v5  ;;  %v209_v47 = vcvt.f32.s32 %v981_v9 }
 0x139   :  { %v999_v38 = vpop.xlane.xlu1 %247  ;;  %v1001_v25 = vpop.xlane.xlu0 %262  ;;  %v150_v14 = vshll.u32 %v149_v24, 16  ;;  %v240_v24 = vshll.u32 %v239_v43, 16 }
 0x13a   :  { %vm249_vm11 = vcmp.eq.f32.partialorder %v893_v31, %v999_v38  ;;  %vm264_vm12 = vcmp.eq.f32.partialorder %v905_v41, %v1001_v25  ;;  %v195_v9 = vshll.u32 %v194_v32, 16 }
 0x13b   :  { %v250_v17 = vsel %vm249_vm11, %v245_v39, inf  ;;  %v265_v26 = vsel %vm264_vm12, %v260_v46, inf  ;;  %v135_v46 = vshll.u32 %v134_v34, 16 }
 0x13c   :  { %251 = vmin.xlane.f32.xlu1 %v250_v17  ;;  %266 = vmin.xlane.f32.xlu0 %v265_v26 }
 0x13d   :  { %v1009_v52 = vpop.xlane.xlu1 %277  ;;  %v1011_v29 = vpop.xlane.xlu0 %292 }
 0x13e   :  { %vm279_vm13 = vcmp.eq.f32.partialorder %v917_v49, %v1009_v52  ;;  %vm294_vm14 = vcmp.eq.f32.partialorder %v929_v60, %v1011_v29  ;;  %v645_v49 = vmov 0.0|0.0  }
 0x13f   :  { %v280_v31 = vsel %vm279_vm13, %v275_v48, inf  ;;  %v295_v41 = vsel %vm294_vm14, %v290_v57, inf  ;;  %608 = vmatprep.subr.bf16.mxu0 %v645_v49  ;;  %v165_v48 = vshll.u32 %v164_v7, 16  ;;  %v269_v7 = vcvt.f32.s32 %v1001_v25 }
 0x140   :  { %281 = vmin.xlane.f32.xlu1 %v280_v31  ;;  %296 = vmin.xlane.f32.xlu0 %v295_v41 }
 0x141   :  { %v1019_v51 = vpop.xlane.xlu1 %307  ;;  %v1021_v56 = vpop.xlane.xlu0 %322 }
 0x142   :  { %vm309_vm15 = vcmp.eq.f32.partialorder %v941_v28, %v1019_v51  ;;  %vm324_vm1 = vcmp.eq.f32.partialorder %v945_v6, %v1021_v56  ;;  %v647_v28 = vmov 0.0   ;;  %v119_v6 = vcvt.f32.s32 %v953_v15 }
 0x143   :  { %v310_v60 = vsel %vm309_vm15, %v305_v16, inf  ;;  %v325_v62 = vsel %vm324_vm1, %v320_v18, inf  ;;  %605 = vmatprep.mubr.msk.f32.mxu0 %vm646_vm3, %v647_v28 }
 0x144   :  { %311 = vmin.xlane.f32.xlu1 %v310_v60  ;;  %326 = vmin.xlane.f32.xlu0 %v325_v62  ;;  %v120_v2 = vshll.u32 %v119_v6, 16 }
 0x145   :  { %v1029_v58 = vpop.xlane.xlu1 %337 }
 0x146   :  { %vm339_vm2 = vcmp.eq.f32.partialorder %v949_v8, %v1029_v58  ;;  %v179_v8 = vcvt.f32.s32 %v971_v50 }
 0x147   :  { %v340_v63 = vsel %vm339_vm2, %v335_v3, inf  ;;  %v210_v3 = vshll.u32 %v209_v47, 16 }
 0x148   :  { %341 = vmin.xlane.f32.xlu1 %v340_v63  ;;  %v180_v21 = vshll.u32 %v179_v8, 16 }
 0x1b5   :  { %v117_v61 = vpop.xlane.xlu0 %116 }
 0x1b6   :  { %v118_v4 = vcvt.f32.s32 %v117_v61 }
 0x1b8   :  { %v121_v13 = vadd.s32 %v120_v2, %v118_v4 }
 0x1b9   :  { %v132_v12 = vpop.xlane.xlu1 %131  ;;  %v147_v39 = vpop.xlane.xlu0 %146 }
 0x1ba   :  { %v133_v27 = vcvt.f32.s32 %v132_v12  ;;  %v148_v17 = vcvt.f32.s32 %v147_v39  ;;  %vm347_vm4 = vcmp.eq.s32.totalorder %v764_v36, %v121_v13 }
 0x1bb   :  { %v523_v31 = vsel %vm347_vm4, 1.0, %v647_v28 }
 0x1bc   :  { %v136_v15 = vadd.s32 %v135_v46, %v133_v27  ;;  %v151_v26 = vadd.s32 %v150_v14, %v148_v17 }
 0x1bd   :  { %v162_v57 = vpop.xlane.xlu1 %161  ;;  %v177_v30 = vpop.xlane.xlu0 %176 }
 0x1be   :  { %vm348_vm5 = vcmp.eq.s32.totalorder %v781_v44, %v136_v15  ;;  %v163_v50 = vcvt.f32.s32 %v162_v57  ;;  %v178_v42 = vcvt.f32.s32 %v177_v30  ;;  %vm349_vm7 = vcmp.eq.s32.totalorder %v767_v37, %v151_v26 }
 0x1bf   :  { %v524_v41 = vsel %vm348_vm5, 1.0, %v647_v28  ;;  %v224_v44 = vcvt.f32.s32 %v989_v19  ;;  %v525_v37 = vsel %vm349_vm7, 1.0, %v647_v28  ;;  %v299_v15 = vcvt.f32.s32 %v1011_v29 }
 0x1c0   :  { %v166_v5 = vadd.s32 %v165_v48, %v163_v50  ;;  %v181_v16 = vadd.s32 %v180_v21, %v178_v42  ;;  %v609_v18 = vpack.c.bf16 %v524_v41, %v523_v31  ;;  %v270_v48 = vshll.u32 %v269_v7, 16 }
 0x1c1   :  { %v192_v60 = vpop.xlane.xlu1 %191  ;;  %v207_v62 = vpop.xlane.xlu0 %206  ;;  %v225_v34 = vshll.u32 %v224_v44, 16  ;;  %v300_v47 = vshll.u32 %v299_v15, 16  ;;  %v314_v42 = vcvt.f32.s32 %v1019_v51 }
 0x1c2   :  { %vm350_vm8 = vcmp.eq.s32.totalorder %v784_v45, %v166_v5  ;;  %v193_v63 = vcvt.f32.s32 %v192_v60  ;;  %v208_v6 = vcvt.f32.s32 %v207_v62  ;;  %611 = vmatpush3.bf16.xpose.msk.msra.mxu0 %vm1047_vm6, %v609_v18  ;;  %vm351_vm9 = vcmp.eq.s32.totalorder %v804_v54, %v181_v16 }
 0x1c3   :  { %v526_v61 = vsel %vm350_vm8, 1.0, %v647_v28  ;;  %612 = vmatprep.subr.bf16.mxu0 %v645_v49  ;;  %v254_v45 = vcvt.f32.s32 %v999_v38  ;;  %v527_v39 = vsel %vm351_vm9, 1.0, %v647_v28  ;;  %v284_v38 = vcvt.f32.s32 %v1009_v52 }
 0x1c4   :  { %v613_v2 = vpack.c.bf16 %v526_v61, %v525_v37  ;;  %v196_v19 = vadd.s32 %v195_v9, %v193_v63  ;;  %v211_v20 = vadd.s32 %v210_v3, %v208_v6  ;;  %v315_v43 = vshll.u32 %v314_v42, 16 }
 0x1c5   :  { %v222_v4 = vpop.xlane.xlu1 %221  ;;  %v237_v13 = vpop.xlane.xlu0 %236  ;;  %v255_v17 = vshll.u32 %v254_v45, 16  ;;  %v285_v30 = vshll.u32 %v284_v38, 16 }
 0x1c6   :  { %vm352_vm10 = vcmp.eq.s32.totalorder %v807_v55, %v196_v19  ;;  %v223_v8 = vcvt.f32.s32 %v222_v4  ;;  %v238_v12 = vcvt.f32.s32 %v237_v13  ;;  %vm353_vm11 = vcmp.eq.s32.totalorder %v828_v0, %v211_v20 }
 0x1c7   :  { %v528_v46 = vsel %vm352_vm10, 1.0, %v647_v28  ;;  %v529_v32 = vsel %vm353_vm11, 1.0, %v647_v28  ;;  %v395_v4 = vcvt.s32.f32 %v761_v33 }
 0x1c8   :  { %v617_v14 = vpack.c.bf16 %v528_v46, %v527_v39  ;;  %v226_v54 = vadd.s32 %v225_v34, %v223_v8  ;;  %v241_v27 = vadd.s32 %v240_v24, %v238_v12 }
 0x1c9   :  { %v252_v26 = vpop.xlane.xlu1 %251  ;;  %v267_v25 = vpop.xlane.xlu0 %266 }
 0x1ca   :  { %vm354_vm12 = vcmp.eq.s32.totalorder %v831_v1, %v226_v54  ;;  %v253_v55 = vcvt.f32.s32 %v252_v26  ;;  %v268_v21 = vcvt.f32.s32 %v267_v25  ;;  %615 = vmatpush3.bf16.xpose.msk.msra.mxu0 %vm1047_vm6, %v613_v2  ;;  %vm355_vm13 = vcmp.eq.s32.totalorder %v852_v10, %v241_v27 }
 0x1cb   :  { %v530_v0 = vsel %vm354_vm12, 1.0, %v647_v28  ;;  %616 = vmatprep.subr.bf16.mxu0 %v645_v49  ;;  %v531_v5 = vsel %vm355_vm13, 1.0, %v647_v28 }
 0x1cc   :  { %v621_v57 = vpack.c.bf16 %v530_v0, %v529_v32  ;;  %v256_v52 = vadd.s32 %v255_v17, %v253_v55  ;;  %v271_v29 = vadd.s32 %v270_v48, %v268_v21 }
 0x1cd   :  { %v282_v50 = vpop.xlane.xlu1 %281  ;;  %v297_v1 = vpop.xlane.xlu0 %296 }
 0x1ce   :  { %vm356_vm14 = vcmp.eq.s32.totalorder %v855_v11, %v256_v52  ;;  %v283_v31 = vcvt.f32.s32 %v282_v50  ;;  %v298_v41 = vcvt.f32.s32 %v297_v1  ;;  %vm357_vm15 = vcmp.eq.s32.totalorder %v876_v22, %v271_v29 }
 0x1cf   :  { %v532_v16 = vsel %vm356_vm14, 1.0, %v647_v28  ;;  %v533_v11 = vsel %vm357_vm15, 1.0, %v647_v28 }
 0x1d0   :  { %v625_v18 = vpack.c.bf16 %v532_v16, %v531_v5  ;;  %v286_v10 = vadd.s32 %v285_v30, %v283_v31  ;;  %v301_v9 = vadd.s32 %v300_v47, %v298_v41 }
 0x1d1   :  { %v312_v44 = vpop.xlane.xlu1 %311  ;;  %v327_v37 = vpop.xlane.xlu0 %326 }
 0x1d2   :  { %vm358_vm1 = vcmp.eq.s32.totalorder %v879_v23, %v286_v10  ;;  %v313_v60 = vcvt.f32.s32 %v312_v44  ;;  %619 = vmatpush3.bf16.xpose.msk.msra.mxu0 %vm1047_vm6, %v617_v14  ;;  %vm359_vm2 = vcmp.eq.s32.totalorder %v900_v35, %v301_v9  ;;  %v344_v35 = vcvt.f32.s32 %v1029_v58 }
 0x1d3   :  { %v534_v51 = vsel %vm358_vm1, 1.0, %v647_v28  ;;  %620 = vmatprep.subr.bf16.mxu0 %v645_v49  ;;  %v535_v3 = vsel %vm359_vm2, 1.0, %v647_v28  ;;  %v328_v19 = vcvt.f32.s32 %v327_v37 }
 0x1d4   :  { %v629_v62 = vpack.c.bf16 %v534_v51, %v533_v11  ;;  %v316_v22 = vadd.s32 %v315_v43, %v313_v60  ;;  %v345_v2 = vshll.u32 %v344_v35, 16 }
 0x1d5   :  { %v342_v6 = vpop.xlane.xlu1 %341 }
 0x1d6   :  { %vm360_vm3 = vcmp.eq.s32.totalorder %v903_v40, %v316_v22  ;;  %v329_v40 = vcvt.f32.s32 %v1021_v56  ;;  %v343_v61 = vcvt.f32.s32 %v342_v6 }
 0x1d7   :  { %v536_v23 = vsel %vm360_vm3, 1.0, %v647_v28 }
 0x1d8   :  { %v633_v63 = vpack.c.bf16 %v536_v23, %v535_v3  ;;  %v330_v20 = vshll.u32 %v329_v40, 16  ;;  %v346_v34 = vadd.s32 %v345_v2, %v343_v61 }
 0x1da   :  { %623 = vmatpush3.bf16.xpose.msk.msra.mxu0 %vm1047_vm6, %v621_v57  ;;  %v331_v24 = vadd.s32 %v330_v20, %v328_v19  ;;  %vm362_vm4 = vcmp.eq.s32.totalorder %v927_v59, %v346_v34 }
 0x1db   :  { %624 = vmatprep.subr.bf16.mxu0 %v645_v49  ;;  %v538_v56 = vsel %vm362_vm4, 1.0, %v647_v28 }
 0x1dc   :  { %vm361_vm5 = vcmp.eq.s32.totalorder %v924_v53, %v331_v24 }
 0x1dd   :  { %v537_v58 = vsel %vm361_vm5, 1.0, %v647_v28 }
 0x1de   :  { %v637_v45 = vpack.c.bf16 %v538_v56, %v537_v58 }
 0x1e2   :  { %627 = vmatpush3.bf16.xpose.msk.msra.mxu0 %vm1047_vm6, %v625_v18 }
 0x1e3   :  { %628 = vmatprep.subr.bf16.mxu0 %v645_v49 }
 0x1ea   :  { %631 = vmatpush3.bf16.xpose.msk.msra.mxu0 %vm1047_vm6, %v629_v62 }
 0x1eb   :  { %632 = vmatprep.subr.bf16.mxu0 %v645_v49 }
 0x1f2   :  { %635 = vmatpush3.bf16.xpose.msk.msra.mxu0 %vm1047_vm6, %v633_v63 }
 0x1f3   :  { %636 = vmatprep.subr.bf16.mxu0 %v645_v49 }
 0x1fa   :  { %639 = vmatpush3.bf16.xpose.msk.msra.mxu0 %vm1047_vm6, %v637_v45 }
 0x201   :  { %606 = vmatmul.mubr.msk.f32.vlgmr.msra.gmra.mrb[0].mxu0 %vm24_vm0, %v395_v4 }
 0x2d4   :  { %v513_v59 = vpop.f32.mrb[0].mxu0 }
 0x2d5   :  { %v640_v13 = vtrunc.f32 %v513_v59  ;;  %v607_v7 = vpop.f32.mrb[1].mxu0 }
 0x2d7   :  { %v641_v8 = vcvt.f32.s32 %v640_v13 }
 0x2d9   :  { %518 = vst [vmem:[%s1117_s1] sm:$0x1] %v641_v8 }

</bundles_post_ra>
